<compile_context>
chip_gen: v7x
topology: tpu7x:2x2x1
jax: 0.10.0
libtpu: 0.0.40
codegen_flags: <defaults>
</compile_context>

<pallas_src>
import jax
import jax.numpy as jnp
from jax.experimental import pallas as pl
from jax.experimental.pallas import tpu as pltpu

# ----------------------------- model dims ----------------------------------
T = 8             # sequence length
B = 2             # batch size
CTX_DIM = 64      # ctx['context_dim']
NZ = 32           # ctx['nz']
IN_HDIM = 128     # specs['in_mlp']['hdim'][-1]
OUT_HDIM = 128    # specs['out_mlp']['hdim'][-1]
PRIOR_HDIM = 128  # specs['prior_mlp']['hdim'][-1]
TRAJ_DIM = 11     # local_orient_type == '6d'
OUT_PAD = 128     # lane-dense padded width of the final Linear
PZ_PAD = 128      # lane-dense padded width of the p_z head (2*NZ=64 used)

_VMEM = pl.BlockSpec(memory_space=pltpu.MemorySpace.VMEM)


# ------------------------------- fused kernel --------------------------------
def fused_kernel(ctx_ref, z_ref,
                 w1z_ref, w1c_ref, b1_ref,
                 w2_ref, b2_ref,
                 w3_ref, b3_ref,
                 pw1_ref, pb1_ref, pzw_ref, pzb_ref,
                 pz_ref, traj_ref):
    """Fused prior head + decoder MLP stack + post-processing epilogue.

    ctx_ref:  [T*B, CTX_DIM]  flattened context (row r = t*B + b), f32
    z_ref:    [B, NZ]         latent sample, f32
    weights:  bf16 (f32 biases)
    outputs:  pz_ref   [B, PZ_PAD]          (cols >= 2*NZ are zero)
              traj_ref [2, T*B, OUT_PAD]    slab 0 = orig, slab 1 = fixed-up out
    """
    f32 = jnp.float32
    bf16 = jnp.bfloat16
    ctx = ctx_ref[...]                    # [T*B, CTX_DIM] f32
    z = z_ref[...]                        # [B, NZ] f32
    rows = ctx.shape[0]                   # T*B (static)
    bsz = z.shape[0]                      # B
    tlen = rows // bsz                    # T

    ctx_bf = ctx.astype(bf16)             # single cast, reused by both heads

    # ---- prior head: mean over time as a tiny selection matmul on the flat tile
    bi = jax.lax.broadcasted_iota(jnp.int32, (bsz, rows), 0)
    ri = jax.lax.broadcasted_iota(jnp.int32, (bsz, rows), 1)
    pool = jnp.where((ri % bsz) == bi, 1.0 / tlen, 0.0).astype(bf16)     # [B, T*B]
    hm = jnp.dot(pool, ctx_bf, preferred_element_type=f32)               # [B, CTX_DIM]
    hp = jnp.maximum(
        jnp.dot(hm.astype(bf16), pw1_ref[...], preferred_element_type=f32)
        + pb1_ref[...], 0.0)                                             # prior_mlp relu
    pz_ref[...] = (jnp.dot(hp.astype(bf16), pzw_ref[...],
                           preferred_element_type=f32) + pzb_ref[...])   # p_z_net (padded)

    # ---- decoder: split first Linear, replicate the z-term with VPU selects ----
    # zb[b] = z[b] @ W1[:NZ] + b1  -> added to every row r with r % B == b
    zb = (jnp.dot(z.astype(bf16), w1z_ref[...], preferred_element_type=f32)
          + b1_ref[...])                                                 # [B, IN_HDIM]
    rmod = jax.lax.broadcasted_iota(jnp.int32, (rows, IN_HDIM), 0) % bsz
    zrep = jnp.zeros((rows, IN_HDIM), f32)
    for b in range(bsz):                                                 # static, B=2
        zrep = jnp.where(rmod == b,
                         jnp.broadcast_to(zb[b:b + 1, :], (rows, IN_HDIM)),
                         zrep)
    h1 = jnp.maximum(
        jnp.dot(ctx_bf, w1c_ref[...], preferred_element_type=f32) + zrep, 0.0)
    h2 = jnp.maximum(
        jnp.dot(h1.astype(bf16), w2_ref[...], preferred_element_type=f32)
        + b2_ref[...], 0.0)                                              # out_mlp relu
    y = (jnp.dot(h2.astype(bf16), w3_ref[...], preferred_element_type=f32)
         + b3_ref[...])                                                  # [T*B, OUT_PAD]

    # ---- stores: slab 0 = orig, slab 1 = out with t==0 rows fixed up ----
    traj_ref[0] = y
    traj_ref[1] = y
    # only the first B rows (t == 0) need the init_xy / heading [0,1] fixup
    ci = jax.lax.broadcasted_iota(jnp.int32, (bsz, OUT_PAD), 1)
    y0 = y[0:bsz, :]
    y0 = jnp.where((ci < 2) | (ci == TRAJ_DIM - 2), 0.0, y0)
    y0 = jnp.where(ci == TRAJ_DIM - 1, 1.0, y0)
    traj_ref[1, 0:bsz, :] = y0


def _fused_forward(ctx_flat, z, params):
    n_rows = ctx_flat.shape[0]
    bsz = z.shape[0]
    return pl.pallas_call(
        fused_kernel,
        out_shape=(
            jax.ShapeDtypeStruct((bsz, PZ_PAD), jnp.float32),
            jax.ShapeDtypeStruct((2, n_rows, OUT_PAD), jnp.float32),
        ),
        in_specs=[_VMEM] * 13,
        out_specs=(_VMEM, _VMEM),
    )(ctx_flat, z,
      params['in_w_z'], params['in_w_c'], params['in_b'],
      params['out_w'], params['out_b'],
      params['fc_w_pad'], params['fc_b_pad'],
      params['prior_w1'], params['prior_b1'],
      params['pz_w_pad'], params['pz_b_pad'])


# --------------------------- full forward (glue) -----------------------------
@jax.jit
def _forward_core(context, q_z_samp, params):
    Tlen, Bsz, _ = context.shape
    ctx_flat = context.reshape(Tlen * Bsz, CTX_DIM)            # row r = t*B + b
    p_z_pad, traj_pad = _fused_forward(ctx_flat, q_z_samp, params)
    p_z = p_z_pad[:, :2 * NZ]
    traj = traj_pad[:, :, :TRAJ_DIM].reshape(2, Tlen, Bsz, TRAJ_DIM)
    return p_z, traj[0], traj[1]


def data_decoder_forward(data, params, mode='train', sample_num=1):
    assert mode in {'train', 'recon'} and sample_num == 1
    # mode=='train' -> z = data['q_z_samp'] (matching the PyTorch module branch)
    p_z_params, orig, out = _forward_core(data['context'], data['q_z_samp'], params)
    # TODO(synk): traj_local2global_heading (external quaternion/heading integration helper) not reimplemented here.
    return {
        'p_z_params': p_z_params,
        f'{mode}_orig_out_local_traj_tp': orig,
        f'{mode}_out_local_traj_tp': out,
    }


# ---------------------------- deterministic params ---------------------------
def init_params(key):
    ks = jax.random.split(key, 10)
    s = 0.1
    bf16 = jnp.bfloat16
    # in_mlp: Linear(NZ+CTX_DIM -> IN_HDIM), stored pre-split (z-rows / ctx-rows)
    in_w = s * jax.random.normal(ks[0], (NZ + CTX_DIM, IN_HDIM), jnp.float32)
    # out_fc: Linear(OUT_HDIM -> TRAJ_DIM), zero-padded to OUT_PAD lanes
    fc_w = s * jax.random.normal(ks[4], (OUT_HDIM, TRAJ_DIM), jnp.float32)
    fc_b = s * jax.random.normal(ks[5], (1, TRAJ_DIM), jnp.float32)
    fc_w_pad = jnp.zeros((OUT_HDIM, OUT_PAD), jnp.float32).at[:, :TRAJ_DIM].set(fc_w)
    fc_b_pad = jnp.zeros((1, OUT_PAD), jnp.float32).at[:, :TRAJ_DIM].set(fc_b)
    # p_z_net: Linear(PRIOR_HDIM -> 2*NZ), zero-padded to PZ_PAD lanes
    pz_w = s * jax.random.normal(ks[8], (PRIOR_HDIM, 2 * NZ), jnp.float32)
    pz_b = s * jax.random.normal(ks[9], (1, 2 * NZ), jnp.float32)
    pz_w_pad = jnp.zeros((PRIOR_HDIM, PZ_PAD), jnp.float32).at[:, :2 * NZ].set(pz_w)
    pz_b_pad = jnp.zeros((1, PZ_PAD), jnp.float32).at[:, :2 * NZ].set(pz_b)
    return {
        # weights in bf16 (native MXU operand dtype), biases in f32
        'in_w_z': in_w[:NZ].astype(bf16),
        'in_w_c': in_w[NZ:].astype(bf16),
        'in_b':   s * jax.random.normal(ks[1], (1, IN_HDIM), jnp.float32),
        # out_mlp: Linear(IN_HDIM -> OUT_HDIM)
        'out_w':  (s * jax.random.normal(ks[2], (IN_HDIM, OUT_HDIM), jnp.float32)).astype(bf16),
        'out_b':  s * jax.random.normal(ks[3], (1, OUT_HDIM), jnp.float32),
        'fc_w_pad': fc_w_pad.astype(bf16),
        'fc_b_pad': fc_b_pad,
        # prior_mlp: Linear(CTX_DIM -> PRIOR_HDIM)
        'prior_w1': (s * jax.random.normal(ks[6], (CTX_DIM, PRIOR_HDIM), jnp.float32)).astype(bf16),
        'prior_b1': s * jax.random.normal(ks[7], (1, PRIOR_HDIM), jnp.float32),
        'pz_w_pad': pz_w_pad.astype(bf16),
        'pz_b_pad': pz_b_pad,
    }


# ------------------------------ pure-JAX reference ---------------------------
def _reference(context, z, params):
    # f32 reference using the (bf16-stored) weights upcast to f32.
    with jax.default_matmul_precision('highest'):
        f32 = jnp.float32
        Tlen, Bsz, _ = context.shape
        in_w = jnp.concatenate([params['in_w_z'].astype(f32),
                                params['in_w_c'].astype(f32)], axis=0)
        # prior head
        h = context.mean(axis=0)
        h = jnp.maximum(h @ params['prior_w1'].astype(f32) + params['prior_b1'], 0.0)
        p_z = (h @ params['pz_w_pad'].astype(f32)[:, :2 * NZ]
               + params['pz_b_pad'][:, :2 * NZ])
        # decoder
        z_rep = jnp.broadcast_to(z[None], (Tlen,) + z.shape)
        x_in = jnp.concatenate([z_rep, context], axis=-1).reshape(-1, NZ + CTX_DIM)
        h1 = jnp.maximum(x_in @ in_w + params['in_b'], 0.0)
        h2 = jnp.maximum(h1 @ params['out_w'].astype(f32) + params['out_b'], 0.0)
        y = (h2 @ params['fc_w_pad'].astype(f32)[:, :TRAJ_DIM]
             + params['fc_b_pad'][:, :TRAJ_DIM])
        orig = y.reshape(Tlen, Bsz, TRAJ_DIM)
        out = (orig.at[0, :, :2].set(0.0)
                   .at[0, :, TRAJ_DIM - 2].set(0.0)
                   .at[0, :, TRAJ_DIM - 1].set(1.0))
        return p_z, orig, out


if __name__ == "__main__":
    key = jax.random.PRNGKey(0)
    k_ctx, k_z, k_p = jax.random.split(key, 3)

    data = {
        'context':    jax.random.normal(k_ctx, (T, B, CTX_DIM), jnp.float32),
        'q_z_samp':   jax.random.normal(k_z, (B, NZ), jnp.float32),
        'batch_size': B,
    }
    params = init_params(k_p)

    out = data_decoder_forward(data, params, mode='train', sample_num=1)
    jax.block_until_ready(out)

    assert out['p_z_params'].shape == (B, 2 * NZ)
    assert out['train_orig_out_local_traj_tp'].shape == (T, B, TRAJ_DIM)
    assert out['train_out_local_traj_tp'].shape == (T, B, TRAJ_DIM)

    # numerical sanity check against a pure-JAX f32 reference
    # (kernel uses bf16 MXU operands with f32 accumulation -> loose tolerance)
    ref_pz, ref_orig, ref_out = _reference(data['context'], data['q_z_samp'], params)
    assert jnp.allclose(out['p_z_params'], ref_pz, atol=2e-2, rtol=2e-2)
    assert jnp.allclose(out['train_orig_out_local_traj_tp'], ref_orig, atol=2e-2, rtol=2e-2)
    assert jnp.allclose(out['train_out_local_traj_tp'], ref_out, atol=2e-2, rtol=2e-2)

    print("KERNEL_OK")
</pallas_src>

<mosaic_0001>
module attributes {stable_mosaic.version = 11 : i64} {
  func.func @fused_kernel(%arg0: memref<16x64xf32, #tpu.memory_space<vmem>>, %arg1: memref<2x32xf32, #tpu.memory_space<vmem>>, %arg2: memref<32x128xbf16, #tpu.memory_space<vmem>>, %arg3: memref<64x128xbf16, #tpu.memory_space<vmem>>, %arg4: memref<1x128xf32, #tpu.memory_space<vmem>>, %arg5: memref<128x128xbf16, #tpu.memory_space<vmem>>, %arg6: memref<1x128xf32, #tpu.memory_space<vmem>>, %arg7: memref<128x128xbf16, #tpu.memory_space<vmem>>, %arg8: memref<1x128xf32, #tpu.memory_space<vmem>>, %arg9: memref<64x128xbf16, #tpu.memory_space<vmem>>, %arg10: memref<1x128xf32, #tpu.memory_space<vmem>>, %arg11: memref<128x128xbf16, #tpu.memory_space<vmem>>, %arg12: memref<1x128xf32, #tpu.memory_space<vmem>>, %arg13: memref<2x128xf32, #tpu.memory_space<vmem>>, %arg14: memref<2x16x128xf32, #tpu.memory_space<vmem>>) attributes {dimension_semantics = [], scalar_prefetch = 0 : i64, scratch_operands = 0 : i64, tpu.core_type = #tpu.core_type<tc>} {
    %c0 = arith.constant 0 : index
    %c0_0 = arith.constant 0 : index
    %0 = vector.load %arg0[%c0, %c0_0] : memref<16x64xf32, #tpu.memory_space<vmem>>, vector<16x64xf32>
    %c0_1 = arith.constant 0 : index
    %c0_2 = arith.constant 0 : index
    %1 = vector.load %arg1[%c0_1, %c0_2] : memref<2x32xf32, #tpu.memory_space<vmem>>, vector<2x32xf32>
    %2 = arith.truncf %0 : vector<16x64xf32> to vector<16x64xbf16>
    %3 = tpu.iota {dimensions = array<i32: 0>} : vector<2x16xi32>
    %4 = tpu.iota {dimensions = array<i32: 1>} : vector<2x16xi32>
    %c2_i32 = arith.constant 2 : i32
    %c0_i32 = arith.constant 0 : i32
    %5 = arith.cmpi eq, %c2_i32, %c0_i32 : i32
    %c1_i32 = arith.constant 1 : i32
    %6 = arith.select %5, %c1_i32, %c2_i32 : i32
    %7 = vector.broadcast %6 : i32 to vector<2x16xi32>
    %8 = arith.remsi %4, %7 : vector<2x16xi32>
    %c0_i32_3 = arith.constant 0 : i32
    %9 = vector.broadcast %c0_i32_3 : i32 to vector<2x16xi32>
    %10 = arith.cmpi ne, %8, %9 : vector<2x16xi32>
    %c0_i32_4 = arith.constant 0 : i32
    %11 = vector.broadcast %c0_i32_4 : i32 to vector<2x16xi32>
    %12 = arith.cmpi slt, %8, %11 : vector<2x16xi32>
    %c0_i32_5 = arith.constant 0 : i32
    %13 = arith.cmpi slt, %6, %c0_i32_5 : i32
    %14 = vector.broadcast %13 : i1 to vector<2x16xi1>
    %15 = vector.broadcast %14 : vector<2x16xi1> to vector<2x16xi1>
    %16 = arith.xori %12, %15 : vector<2x16xi1>
    %17 = arith.andi %16, %10 : vector<2x16xi1>
    %18 = vector.broadcast %6 : i32 to vector<2x16xi32>
    %19 = arith.addi %8, %18 : vector<2x16xi32>
    %20 = arith.select %17, %19, %8 : vector<2x16xi1>, vector<2x16xi32>
    %21 = arith.cmpi eq, %20, %3 : vector<2x16xi32>
    %cst = arith.constant 1.250000e-01 : f32
    %cst_6 = arith.constant 0.000000e+00 : f32
    %22 = vector.broadcast %cst : f32 to vector<2x16xf32>
    %23 = vector.broadcast %cst_6 : f32 to vector<2x16xf32>
    %24 = arith.select %21, %22, %23 : vector<2x16xi1>, vector<2x16xf32>
    %25 = arith.truncf %24 : vector<2x16xf32> to vector<2x16xbf16>
    %cst_7 = arith.constant dense<0.000000e+00> : vector<2x64xf32>
    %26 = tpu.matmul %25, %2, %cst_7 {dimension_numbers = #tpu.dot_dimension_numbers<[1], [0], [0], [1], [0, 0, 1, 1], [], []>} : vector<2x16xbf16>, vector<16x64xbf16>, vector<2x64xf32> -> vector<2x64xf32>
    %27 = arith.truncf %26 : vector<2x64xf32> to vector<2x64xbf16>
    %c0_8 = arith.constant 0 : index
    %c0_9 = arith.constant 0 : index
    %28 = vector.load %arg9[%c0_8, %c0_9] : memref<64x128xbf16, #tpu.memory_space<vmem>>, vector<64x128xbf16>
    %cst_10 = arith.constant dense<0.000000e+00> : vector<2x128xf32>
    %29 = tpu.matmul %27, %28, %cst_10 {dimension_numbers = #tpu.dot_dimension_numbers<[1], [0], [0], [1], [0, 0, 1, 1], [], []>} : vector<2x64xbf16>, vector<64x128xbf16>, vector<2x128xf32> -> vector<2x128xf32>
    %c0_11 = arith.constant 0 : index
    %c0_12 = arith.constant 0 : index
    %30 = vector.load %arg10[%c0_11, %c0_12] : memref<1x128xf32, #tpu.memory_space<vmem>>, vector<1x128xf32>
    %31 = vector.broadcast %30 : vector<1x128xf32> to vector<2x128xf32>
    %32 = arith.addf %29, %31 : vector<2x128xf32>
    %cst_13 = arith.constant 0.000000e+00 : f32
    %33 = vector.broadcast %cst_13 : f32 to vector<2x128xf32>
    %34 = arith.maximumf %32, %33 : vector<2x128xf32>
    %35 = arith.truncf %34 : vector<2x128xf32> to vector<2x128xbf16>
    %c0_14 = arith.constant 0 : index
    %c0_15 = arith.constant 0 : index
    %36 = vector.load %arg11[%c0_14, %c0_15] : memref<128x128xbf16, #tpu.memory_space<vmem>>, vector<128x128xbf16>
    %cst_16 = arith.constant dense<0.000000e+00> : vector<2x128xf32>
    %37 = tpu.matmul %35, %36, %cst_16 {dimension_numbers = #tpu.dot_dimension_numbers<[1], [0], [0], [1], [0, 0, 1, 1], [], []>} : vector<2x128xbf16>, vector<128x128xbf16>, vector<2x128xf32> -> vector<2x128xf32>
    %c0_17 = arith.constant 0 : index
    %c0_18 = arith.constant 0 : index
    %38 = vector.load %arg12[%c0_17, %c0_18] : memref<1x128xf32, #tpu.memory_space<vmem>>, vector<1x128xf32>
    %39 = vector.broadcast %38 : vector<1x128xf32> to vector<2x128xf32>
    %40 = arith.addf %37, %39 : vector<2x128xf32>
    %c0_19 = arith.constant 0 : index
    %c0_20 = arith.constant 0 : index
    %41 = vector.load %arg13[%c0_19, %c0_20] : memref<2x128xf32, #tpu.memory_space<vmem>>, vector<2x128xf32>
    tpu.vector_store %arg13[%c0_19, %c0_20], %40 {strides = array<i32>} : memref<2x128xf32, #tpu.memory_space<vmem>>, vector<2x128xf32>,
    %42 = arith.truncf %1 : vector<2x32xf32> to vector<2x32xbf16>
    %c0_21 = arith.constant 0 : index
    %c0_22 = arith.constant 0 : index
    %43 = vector.load %arg2[%c0_21, %c0_22] : memref<32x128xbf16, #tpu.memory_space<vmem>>, vector<32x128xbf16>
    %cst_23 = arith.constant dense<0.000000e+00> : vector<2x128xf32>
    %44 = tpu.matmul %42, %43, %cst_23 {dimension_numbers = #tpu.dot_dimension_numbers<[1], [0], [0], [1], [0, 0, 1, 1], [], []>} : vector<2x32xbf16>, vector<32x128xbf16>, vector<2x128xf32> -> vector<2x128xf32>
    %c0_24 = arith.constant 0 : index
    %c0_25 = arith.constant 0 : index
    %45 = vector.load %arg4[%c0_24, %c0_25] : memref<1x128xf32, #tpu.memory_space<vmem>>, vector<1x128xf32>
    %46 = vector.broadcast %45 : vector<1x128xf32> to vector<2x128xf32>
    %47 = arith.addf %44, %46 : vector<2x128xf32>
    %48 = tpu.iota {dimensions = array<i32: 0>} : vector<16x128xi32>
    %c2_i32_26 = arith.constant 2 : i32
    %c0_i32_27 = arith.constant 0 : i32
    %49 = arith.cmpi eq, %c2_i32_26, %c0_i32_27 : i32
    %c1_i32_28 = arith.constant 1 : i32
    %50 = arith.select %49, %c1_i32_28, %c2_i32_26 : i32
    %51 = vector.broadcast %50 : i32 to vector<16x128xi32>
    %52 = arith.remsi %48, %51 : vector<16x128xi32>
    %c0_i32_29 = arith.constant 0 : i32
    %53 = vector.broadcast %c0_i32_29 : i32 to vector<16x128xi32>
    %54 = arith.cmpi ne, %52, %53 : vector<16x128xi32>
    %c0_i32_30 = arith.constant 0 : i32
    %55 = vector.broadcast %c0_i32_30 : i32 to vector<16x128xi32>
    %56 = arith.cmpi slt, %52, %55 : vector<16x128xi32>
    %c0_i32_31 = arith.constant 0 : i32
    %57 = arith.cmpi slt, %50, %c0_i32_31 : i32
    %58 = vector.broadcast %57 : i1 to vector<16x128xi1>
    %59 = vector.broadcast %58 : vector<16x128xi1> to vector<16x128xi1>
    %60 = arith.xori %56, %59 : vector<16x128xi1>
    %61 = arith.andi %60, %54 : vector<16x128xi1>
    %62 = vector.broadcast %50 : i32 to vector<16x128xi32>
    %63 = arith.addi %52, %62 : vector<16x128xi32>
    %64 = arith.select %61, %63, %52 : vector<16x128xi1>, vector<16x128xi32>
    %cst_32 = arith.constant 0.000000e+00 : f32
    %65 = vector.broadcast %cst_32 : f32 to vector<16x128xf32>
    %c0_i32_33 = arith.constant 0 : i32
    %66 = vector.broadcast %c0_i32_33 : i32 to vector<16x128xi32>
    %67 = arith.cmpi eq, %64, %66 : vector<16x128xi32>
    %68 = vector.extract_strided_slice %47 {offsets = [0, 0], sizes = [1, 128], strides = [1, 1]} : vector<2x128xf32> to vector<1x128xf32>
    %69 = vector.shape_cast %68 : vector<1x128xf32> to vector<1x128xf32>
    %70 = vector.broadcast %69 : vector<1x128xf32> to vector<16x128xf32>
    %71 = arith.select %67, %70, %65 : vector<16x128xi1>, vector<16x128xf32>
    %c1_i32_34 = arith.constant 1 : i32
    %72 = vector.broadcast %c1_i32_34 : i32 to vector<16x128xi32>
    %73 = arith.cmpi eq, %64, %72 : vector<16x128xi32>
    %74 = vector.extract_strided_slice %47 {offsets = [1, 0], sizes = [1, 128], strides = [1, 1]} : vector<2x128xf32> to vector<1x128xf32>
    %75 = vector.shape_cast %74 : vector<1x128xf32> to vector<1x128xf32>
    %76 = vector.broadcast %75 : vector<1x128xf32> to vector<16x128xf32>
    %77 = arith.select %73, %76, %71 : vector<16x128xi1>, vector<16x128xf32>
    %c0_35 = arith.constant 0 : index
    %c0_36 = arith.constant 0 : index
    %78 = vector.load %arg3[%c0_35, %c0_36] : memref<64x128xbf16, #tpu.memory_space<vmem>>, vector<64x128xbf16>
    %cst_37 = arith.constant dense<0.000000e+00> : vector<16x128xf32>
    %79 = tpu.matmul %2, %78, %cst_37 {dimension_numbers = #tpu.dot_dimension_numbers<[1], [0], [0], [1], [0, 0, 1, 1], [], []>} : vector<16x64xbf16>, vector<64x128xbf16>, vector<16x128xf32> -> vector<16x128xf32>
    %80 = arith.addf %79, %77 : vector<16x128xf32>
    %cst_38 = arith.constant 0.000000e+00 : f32
    %81 = vector.broadcast %cst_38 : f32 to vector<16x128xf32>
    %82 = arith.maximumf %80, %81 : vector<16x128xf32>
    %83 = arith.truncf %82 : vector<16x128xf32> to vector<16x128xbf16>
    %c0_39 = arith.constant 0 : index
    %c0_40 = arith.constant 0 : index
    %84 = vector.load %arg5[%c0_39, %c0_40] : memref<128x128xbf16, #tpu.memory_space<vmem>>, vector<128x128xbf16>
    %cst_41 = arith.constant dense<0.000000e+00> : vector<16x128xf32>
    %85 = tpu.matmul %83, %84, %cst_41 {dimension_numbers = #tpu.dot_dimension_numbers<[1], [0], [0], [1], [0, 0, 1, 1], [], []>} : vector<16x128xbf16>, vector<128x128xbf16>, vector<16x128xf32> -> vector<16x128xf32>
    %c0_42 = arith.constant 0 : index
    %c0_43 = arith.constant 0 : index
    %86 = vector.load %arg6[%c0_42, %c0_43] : memref<1x128xf32, #tpu.memory_space<vmem>>, vector<1x128xf32>
    %87 = vector.broadcast %86 : vector<1x128xf32> to vector<16x128xf32>
    %88 = arith.addf %85, %87 : vector<16x128xf32>
    %cst_44 = arith.constant 0.000000e+00 : f32
    %89 = vector.broadcast %cst_44 : f32 to vector<16x128xf32>
    %90 = arith.maximumf %88, %89 : vector<16x128xf32>
    %91 = arith.truncf %90 : vector<16x128xf32> to vector<16x128xbf16>
    %c0_45 = arith.constant 0 : index
    %c0_46 = arith.constant 0 : index
    %92 = vector.load %arg7[%c0_45, %c0_46] : memref<128x128xbf16, #tpu.memory_space<vmem>>, vector<128x128xbf16>
    %cst_47 = arith.constant dense<0.000000e+00> : vector<16x128xf32>
    %93 = tpu.matmul %91, %92, %cst_47 {dimension_numbers = #tpu.dot_dimension_numbers<[1], [0], [0], [1], [0, 0, 1, 1], [], []>} : vector<16x128xbf16>, vector<128x128xbf16>, vector<16x128xf32> -> vector<16x128xf32>
    %c0_48 = arith.constant 0 : index
    %c0_49 = arith.constant 0 : index
    %94 = vector.load %arg8[%c0_48, %c0_49] : memref<1x128xf32, #tpu.memory_space<vmem>>, vector<1x128xf32>
    %95 = vector.broadcast %94 : vector<1x128xf32> to vector<16x128xf32>
    %96 = arith.addf %93, %95 : vector<16x128xf32>
    %c0_50 = arith.constant 0 : index
    %c0_51 = arith.constant 0 : index
    %c0_52 = arith.constant 0 : index
    %97 = vector.load %arg14[%c0_50, %c0_51, %c0_52] : memref<2x16x128xf32, #tpu.memory_space<vmem>>, vector<1x16x128xf32>
    %98 = vector.shape_cast %97 : vector<1x16x128xf32> to vector<16x128xf32>
    %99 = vector.shape_cast %96 : vector<16x128xf32> to vector<1x16x128xf32>
    tpu.vector_store %arg14[%c0_50, %c0_51, %c0_52], %99 {strides = array<i32>} : memref<2x16x128xf32, #tpu.memory_space<vmem>>, vector<1x16x128xf32>,
    %c1 = arith.constant 1 : index
    %c0_53 = arith.constant 0 : index
    %c0_54 = arith.constant 0 : index
    %100 = vector.load %arg14[%c1, %c0_53, %c0_54] : memref<2x16x128xf32, #tpu.memory_space<vmem>>, vector<1x16x128xf32>
    %101 = vector.shape_cast %100 : vector<1x16x128xf32> to vector<16x128xf32>
    %102 = vector.shape_cast %96 : vector<16x128xf32> to vector<1x16x128xf32>
    tpu.vector_store %arg14[%c1, %c0_53, %c0_54], %102 {strides = array<i32>} : memref<2x16x128xf32, #tpu.memory_space<vmem>>, vector<1x16x128xf32>,
    %103 = tpu.iota {dimensions = array<i32: 1>} : vector<2x128xi32>
    %104 = vector.extract_strided_slice %96 {offsets = [0, 0], sizes = [2, 128], strides = [1, 1]} : vector<16x128xf32> to vector<2x128xf32>
    %c2_i32_55 = arith.constant 2 : i32
    %105 = vector.broadcast %c2_i32_55 : i32 to vector<2x128xi32>
    %106 = arith.cmpi slt, %103, %105 : vector<2x128xi32>
    %c9_i32 = arith.constant 9 : i32
    %107 = vector.broadcast %c9_i32 : i32 to vector<2x128xi32>
    %108 = arith.cmpi eq, %103, %107 : vector<2x128xi32>
    %109 = arith.ori %106, %108 : vector<2x128xi1>
    %cst_56 = arith.constant 0.000000e+00 : f32
    %110 = vector.broadcast %cst_56 : f32 to vector<2x128xf32>
    %111 = arith.select %109, %110, %104 : vector<2x128xi1>, vector<2x128xf32>
    %c10_i32 = arith.constant 10 : i32
    %112 = vector.broadcast %c10_i32 : i32 to vector<2x128xi32>
    %113 = arith.cmpi eq, %103, %112 : vector<2x128xi32>
    %cst_57 = arith.constant 1.000000e+00 : f32
    %114 = vector.broadcast %cst_57 : f32 to vector<2x128xf32>
    %115 = arith.select %113, %114, %111 : vector<2x128xi1>, vector<2x128xf32>
    %c1_58 = arith.constant 1 : index
    %c0_59 = arith.constant 0 : index
    %c0_60 = arith.constant 0 : index
    %116 = vector.load %arg14[%c1_58, %c0_59, %c0_60] : memref<2x16x128xf32, #tpu.memory_space<vmem>>, vector<1x2x128xf32>
    %117 = vector.shape_cast %116 : vector<1x2x128xf32> to vector<2x128xf32>
    %118 = vector.shape_cast %115 : vector<2x128xf32> to vector<1x2x128xf32>
    tpu.vector_store %arg14[%c1_58, %c0_59, %c0_60], %118 {strides = array<i32>} : memref<2x16x128xf32, #tpu.memory_space<vmem>>, vector<1x2x128xf32>,
    return
  }
}

</mosaic_0001>

<bundles_post_ra>
// kernel: _forward_core.1
= control target key start
LH: loop header
LB: loop body
LE: loop exit
PB: predicated region body
PF: predicated region fallthrough
CT: control target
= control target key end

     0   :  { %20 = vsyncpa [#allocation3], 0  ;;  %s1542_s0 = inlined_call_operand.hbm [shape: f32[16,64], index: 0, kind: input, shape index: {}]   ;;  %s1543_s1 = inlined_call_operand.vmem [shape: f32[2,32], index: 1, kind: input, shape index: {}]   ;;  %s1544_s2 = inlined_call_operand.hbm [shape: bf16[32,128], index: 2, kind: input, shape index: {}]   ;;  %s1545_s3 = inlined_call_operand.hbm [shape: bf16[64,128], index: 3, kind: input, shape index: {}]   ;;  %s1546_s4 = inlined_call_operand.vmem [shape: f32[1,128], index: 4, kind: input, shape index: {}]   ;;  %s1547_s5 = inlined_call_operand.hbm [shape: bf16[128,128], index: 5, kind: input, shape index: {}]   ;;  %s1548_s6 = inlined_call_operand.vmem [shape: f32[1,128], index: 6, kind: input, shape index: {}]   ;;  %s1549_s7 = inlined_call_operand.hbm [shape: bf16[128,128], index: 7, kind: input, shape index: {}]   ;;  %s1550_s8 = inlined_call_operand.vmem [shape: f32[1,128], index: 8, kind: input, shape index: {}]   ;;  %s1551_s9 = inlined_call_operand.vmem [shape: bf16[64,128], index: 9, kind: input, shape index: {}]   ;;  %s1552_s10 = inlined_call_operand.vmem [shape: f32[1,128], index: 10, kind: input, shape index: {}]   ;;  %s1553_s11 = inlined_call_operand.hbm [shape: bf16[128,128], index: 11, kind: input, shape index: {}]   ;;  %s1554_s12 = inlined_call_operand.vmem [shape: f32[1,128], index: 12, kind: input, shape index: {}]   ;;  %s1555_s13 = inlined_call_operand.hbm [shape: f32[2,128], index: 13, kind: output, shape index: {0}]   ;;  %s1556_s14 = inlined_call_operand.vmem [shape: f32[2,16,128], index: 14, kind: output, shape index: {1}]  }
   0x1   :  { %21 = vsyncpa [#allocation6], 0 }
   0x2   :  { %22 = vsyncpa [#allocation9], 0 }
   0x3   :  { %23 = vsyncpa [#allocation12], 0 }
   0x4   :  { %24 = vsyncpa [#allocation4], 0  ;;  %s1241_s29 = smov [#allocation5]   ;;  %s1077_s17 = scalar_lea.hbm %s1544_s2, 256 }
   0x5   :  { %s44_s30 = sshll.u32 %s1241_s29, 4  ;;  %p1078_p0 = scmp.ne.s32.totalorder %s1544_s2, %s1077_s17  ;;  %s45_s30 = int_to_ptr.vmem [resolvable:$true] %s44_s30 }
   0x6   :  { %p1081_p1 = scmp.lt.u32.totalorder %s1077_s17, %s1544_s2 }
   0x8   :  { %p1083_p2 = pnand %p1081_p1, %p1078_p0 }
   0xa   :  { %1086 = shalt.err (!%p1083_p2)
}
   0xb   :  { %s1087_s22 = scalar_lea.vmem %s45_s30, 256  ;;  %p1092_p4 = scmp.lt.s32.totalorder %s45_s30, %s45_s30 }
   0xc   :  { %p1088_p3 = scmp.ne.s32.totalorder %s45_s30, %s1087_s22  ;;  %p1093_p5 = scmp.lt.s32.totalorder %s1087_s22, %s1087_s22 }
   0xe   :  { %p1094_p6 = por %p1093_p5, %p1092_p4 }
  0x10   :  { %p1095_p7 = pnand %p1094_p6, %p1088_p3 }
  0x12   :  { %1098 = shalt.err (!%p1095_p7)
}
  0x13   :  { %s1242_s23 = smov 64   ;;  %s1243_s24 = smov 4  }
  0x14   :  { %50 = dma.hbm_to_vmem [thread:$0]  %s1544_s2, 256, %s45_s30, [#allocation6], %s1242_s23, %s1242_s23, %s1243_s24  }
  0x15   :  { %s1244_s27 = smov [#allocation8]   ;;  %s1245_s29 = smov [#allocation2]  }
  0x16   :  { %s70_s28 = sshll.u32 %s1244_s27, 4  ;;  %s30_s15 = sshll.u32 %s1245_s29, 4  ;;  %s71_s28 = int_to_ptr.vmem [resolvable:$true] %s70_s28  ;;  %s31_s15 = int_to_ptr.vmem [resolvable:$true] %s30_s15 }
  0x17   :  { %s1099_s18 = scalar_lea.hbm %s1547_s5, 1024 }
  0x18   :  { %p1100_p8 = scmp.ne.s32.totalorder %s1547_s5, %s1099_s18  ;;  %p1103_p9 = scmp.lt.u32.totalorder %s1099_s18, %s1547_s5 }
  0x1a   :  { %p1105_p10 = pnand %p1103_p9, %p1100_p8 }
  0x1c   :  { %1108 = shalt.err (!%p1105_p10)
}
  0x1d   :  { %s1109_s2 = scalar_lea.vmem %s71_s28, 1024  ;;  %p1114_p12 = scmp.lt.s32.totalorder %s71_s28, %s71_s28 }
  0x1e   :  { %p1110_p11 = scmp.ne.s32.totalorder %s71_s28, %s1109_s2  ;;  %p1115_p13 = scmp.lt.s32.totalorder %s1109_s2, %s1109_s2 }
  0x20   :  { %p1116_p0 = por %p1115_p13, %p1114_p12 }
  0x22   :  { %p1117_p1 = pnand %p1116_p0, %p1110_p11 }
  0x24   :  { %1120 = shalt.err (!%p1117_p1)
}
  0x25   :  { %76 = dma.hbm_to_vmem [thread:$0]  %s1547_s5, 1024, %s71_s28, [#allocation9], %s1242_s23, %s1242_s23, %s1243_s24  }
  0x26   :  { %s1121_s29 = scalar_lea.hbm %s1542_s0, 256 }
  0x27   :  { %p1122_p2 = scmp.ne.s32.totalorder %s1542_s0, %s1121_s29  ;;  %p1125_p3 = scmp.lt.u32.totalorder %s1121_s29, %s1542_s0 }
  0x29   :  { %p1127_p4 = pnand %p1125_p3, %p1122_p2 }
  0x2b   :  { %1130 = shalt.err (!%p1127_p4)
}
  0x2c   :  { %s1131_s20 = scalar_lea.vmem %s31_s15, 256  ;;  %p1136_p6 = scmp.lt.s32.totalorder %s31_s15, %s31_s15 }
  0x2d   :  { %p1132_p5 = scmp.ne.s32.totalorder %s31_s15, %s1131_s20  ;;  %p1137_p7 = scmp.lt.s32.totalorder %s1131_s20, %s1131_s20 }
  0x2f   :  { %p1138_p8 = por %p1137_p7, %p1136_p6 }
  0x31   :  { %p1139_p9 = pnand %p1138_p8, %p1132_p5 }
  0x33   :  { %1142 = shalt.err (!%p1139_p9)
}
  0x34   :  { %s1246_s5 = smov 128   ;;  %s1247_s28 = smov 8  }
  0x35   :  { %36 = dma.hbm_to_vmem [thread:$0]  %s1542_s0, 256, %s31_s15, [#allocation3], %s1246_s5, %s1246_s5, %s1247_s28  }
  0x36   :  { %s1248_s2 = smov [#allocation7]   ;;  %s1249_s25 = smov [#allocation10]  }
  0x37   :  { %s56_s30 = sshll.u32 %s1248_s2, 4  ;;  %s84_s26 = sshll.u32 %s1249_s25, 4  ;;  %s57_s30 = int_to_ptr.vmem [resolvable:$true] %s56_s30  ;;  %s85_s26 = int_to_ptr.vmem [resolvable:$true] %s84_s26 }
  0x38   :  { %s1143_s16 = scalar_lea.hbm %s1545_s3, 512 }
  0x39   :  { %p1144_p10 = scmp.ne.s32.totalorder %s1545_s3, %s1143_s16  ;;  %p1147_p11 = scmp.lt.u32.totalorder %s1143_s16, %s1545_s3 }
  0x3b   :  { %p1149_p12 = pnand %p1147_p11, %p1144_p10 }
  0x3d   :  { %1152 = shalt.err (!%p1149_p12)
}
  0x3e   :  { %s1153_s0 = scalar_lea.vmem %s57_s30, 512  ;;  %p1158_p0 = scmp.lt.s32.totalorder %s57_s30, %s57_s30 }
  0x3f   :  { %p1154_p13 = scmp.ne.s32.totalorder %s57_s30, %s1153_s0  ;;  %p1159_p1 = scmp.lt.s32.totalorder %s1153_s0, %s1153_s0 }
  0x41   :  { %p1160_p2 = por %p1159_p1, %p1158_p0 }
  0x43   :  { %p1161_p3 = pnand %p1160_p2, %p1154_p13 }
  0x45   :  { %1164 = shalt.err (!%p1161_p3)
}
  0x46   :  { %62 = dma.hbm_to_vmem [thread:$0]  %s1545_s3, 512, %s57_s30, [#allocation6], %s1242_s23, %s1242_s23, %s1243_s24  }
  0x47   :  { %s1165_s22 = scalar_lea.hbm %s1549_s7, 1024 }
  0x48   :  { %p1166_p4 = scmp.ne.s32.totalorder %s1549_s7, %s1165_s22  ;;  %p1169_p5 = scmp.lt.u32.totalorder %s1165_s22, %s1549_s7 }
  0x4a   :  { %p1171_p6 = pnand %p1169_p5, %p1166_p4 }
  0x4c   :  { %1174 = shalt.err (!%p1171_p6)
}
  0x4d   :  { %s1175_s16 = scalar_lea.vmem %s85_s26, 1024  ;;  %p1180_p8 = scmp.lt.s32.totalorder %s85_s26, %s85_s26 }
  0x4e   :  { %p1176_p7 = scmp.ne.s32.totalorder %s85_s26, %s1175_s16  ;;  %p1181_p9 = scmp.lt.s32.totalorder %s1175_s16, %s1175_s16 }
  0x50   :  { %p1182_p10 = por %p1181_p9, %p1180_p8 }
  0x52   :  { %p1183_p11 = pnand %p1182_p10, %p1176_p7 }
  0x54   :  { %1186 = shalt.err (!%p1183_p11)
}
  0x55   :  { %90 = dma.hbm_to_vmem [thread:$0]  %s1549_s7, 1024, %s85_s26, [#allocation9], %s1242_s23, %s1242_s23, %s1243_s24  }
  0x56   :  { %s1250_s17 = smov [#allocation11]   ;;  %s1187_s0 = scalar_lea.hbm %s1553_s11, 1024 }
  0x57   :  { %s102_s18 = sshll.u32 %s1250_s17, 4  ;;  %p1188_p12 = scmp.ne.s32.totalorder %s1553_s11, %s1187_s0  ;;  %s103_s18 = int_to_ptr.vmem [resolvable:$true] %s102_s18 }
  0x58   :  { %p1191_p13 = scmp.lt.u32.totalorder %s1187_s0, %s1553_s11 }
  0x5a   :  { %p1193_p0 = pnand %p1191_p13, %p1188_p12 }
  0x5c   :  { %1196 = shalt.err (!%p1193_p0)
}
  0x5d   :  { %s1197_s22 = scalar_lea.vmem %s103_s18, 1024  ;;  %p1202_p2 = scmp.lt.s32.totalorder %s103_s18, %s103_s18 }
  0x5e   :  { %p1198_p1 = scmp.ne.s32.totalorder %s103_s18, %s1197_s22  ;;  %p1203_p3 = scmp.lt.s32.totalorder %s1197_s22, %s1197_s22 }
  0x60   :  { %p1204_p4 = por %p1203_p3, %p1202_p2 }
  0x62   :  { %p1205_p5 = pnand %p1204_p4, %p1198_p1 }
  0x64   :  { %1208 = shalt.err (!%p1205_p5)
}
  0x65   :  { %108 = dma.hbm_to_vmem [thread:$0]  %s1553_s11, 1024, %s103_s18, [#allocation12], %s1242_s23, %s1242_s23, %s1243_s24  }
  0x66   :  { %1231 = dma.done.wait [#allocation3], 256  }
  0x67   :  { %1232 = vsyncadd [#allocation3], 4294967040 }
  0x68   :  { %1233 = dma.done.wait [#allocation6], 768  }
  0x69   :  { %1234 = vsyncadd [#allocation6], 4294966528 }
  0x6a   :  { %1235 = dma.done.wait [#allocation9], 2048  }
  0x6b   :  { %1236 = vsyncadd [#allocation9], 4294965248 }
  0x6c   :  { %1237 = dma.done.wait [#allocation12], 1024  }
  0x6d   :  { %1238 = vsyncadd [#allocation12], 4294966272  ;;  %v134_v0 = vlaneseq  ;;  %v1251_v1 = vmov 0.0   ;;  %vm1252_vm0 = vmmov 0   ;;  %v130_v5 = vld [vmem:[#allocation2] sm:$0xff]  ;;  %v131_v6 = vld [vmem:[#allocation2 + $0x8] sm:$0xff] }
  0x6e   :  { %932 = vmatprep.subr.bf16.mxu0 %v1251_v1  ;;  %934 = vmatprep.mubr.msk.bf16.mxu0 %vm1252_vm0, %v1251_v1  ;;  %v1429_v8 = vpack.c.bf16 %v131_v6, %v130_v5  ;;  %v1043_v9 = vld [vmem:[%s1551_s9] sm:$0xff]   ;;  %vm153_vm2 = vcmask 130048   ;;  %v1044_v11 = vld [vmem:[%s1551_s9 + $0x8] sm:$0xff]   ;;  %v1045_v12 = vld [vmem:[%s1551_s9 + $0x10] sm:$0xff]   ;;  %vm237_vm3 = vcmask 523264   ;;  %vm419_vm4 = vcmask 261120  }
  0x6f   :  { %v1419_v2 = vshrl.u32 %v134_v0, 7  ;;  %v1421_v3 = vand.u32 127, %v134_v0  ;;  %938 = vmatprep.subr.bf16.mxu1 %v1251_v1  ;;  %946 = vmatprep.mubr.msk.bf16.mxu1 %vm1252_vm0, %v1251_v1  ;;  %v1046_v13 = vld [vmem:[%s1551_s9 + $0x18] sm:$0xff]   ;;  %v1053_v14 = vld [vmem:[#allocation11] sm:$0xff]   ;;  %v1054_v15 = vld [vmem:[#allocation11 + $0x8] sm:$0xff]  }
  0x70   :  { %933 = vmatpush3.bf16.msra.mxu0 %v1429_v8  ;;  %939 = vmatpush3.bf16.msra.mxu1 %v1043_v9  ;;  %v1055_v16 = vld [vmem:[#allocation11 + $0x10] sm:$0xff]   ;;  %v1056_v17 = vld [vmem:[#allocation11 + $0x18] sm:$0xff]   ;;  %v1057_v18 = vld [vmem:[#allocation11 + $0x20] sm:$0xff]  }
  0x71   :  { %v142_v4 = vand.u32 1, %v1421_v3  ;;  %940 = vmatprep.subr.bf16.mxu1 %v1251_v1  ;;  %950 = vmatprep.subr.bf16.mxu0 %v1251_v1  ;;  %v1058_v19 = vld [vmem:[#allocation11 + $0x28] sm:$0xff]   ;;  %v1059_v20 = vld [vmem:[#allocation11 + $0x30] sm:$0xff]   ;;  %v1048_v27 = vld [vmem:[#allocation5 + $0x8] sm:$0xff]   ;;  %v463_v51 = vadd.s32 8, %v1419_v2  ;;  %v492_v53 = vsub.s32 0, %v1419_v2 }
  0x72   :  { %v1047_v22 = vld [vmem:[#allocation5] sm:$0xff]   ;;  %v132_v28 = vld [vmem:[%s1543_s1] sm:$0x3]  ;;  %v1050_v31 = vld [vmem:[#allocation7 + $0x8] sm:$0xff]   ;;  %v468_v54 = vand.u32 1, %v1419_v2  ;;  %v500_v55 = vsub.s32 1, %v1419_v2 }
  0x73   :  { %vm150_vm1 = vcmp.eq.s32.totalorder %v142_v4, %v1419_v2  ;;  %v395_v29 = vpack.c.bf16 %v132_v28, %v132_v28  ;;  %v1049_v30 = vld [vmem:[#allocation7] sm:$0xff]   ;;  %v1051_v32 = vld [vmem:[#allocation7 + $0x10] sm:$0xff]   ;;  %v1052_v33 = vld [vmem:[#allocation7 + $0x18] sm:$0xff]   ;;  %v475_v57 = vand.u32 1, %v463_v51 }
  0x74   :  { %v151_v7 = vsel %vm150_vm1, 0.125, %v1251_v1  ;;  %941 = vmatpush3.bf16.msra.mxu1 %v1044_v11  ;;  %v1060_v34 = vld [vmem:[#allocation11 + $0x38] sm:$0xff]   ;;  %v845_v35 = vld [vmem:[%s1552_s10] ss:$0 sm:$0xff]  ;;  %v1062_v45 = vld [vmem:[#allocation8 + $0x8] sm:$0xff]   ;;  %vm488_vm5 = vcmp.eq.s32.totalorder %v468_v54, 0 }
  0x75   :  { %v152_v10 = vpack.c.bf16 %v151_v7, %v151_v7  ;;  %942 = vmatprep.subr.bf16.mxu1 %v1251_v1  ;;  %v1061_v42 = vld [vmem:[#allocation8] sm:$0xff]   ;;  %v1063_v50 = vld [vmem:[#allocation8 + $0x10] sm:$0xff]   ;;  %v1064_v56 = vld [vmem:[#allocation8 + $0x18] sm:$0xff]   ;;  %vm489_vm6 = vcmp.eq.s32.totalorder %v475_v57, 0  ;;  %vm496_vm7 = vcmp.eq.s32.totalorder %v468_v54, 1  ;;  %vm497_vm8 = vcmp.eq.s32.totalorder %v475_v57, 1 }
  0x76   :  { %v860_v47 = vld [vmem:[%s1546_s4] ss:$0 sm:$0xff]  ;;  %v1066_v2 = vld [vmem:[#allocation8 + $0x28] sm:$0xff]  }
  0x77   :  { %935 = vmatmul.mubr.msk.bf16.vlgmr.msra.gmra.mrb[0].mxu0 %vm153_vm2, %v152_v10  ;;  %v1065_v60 = vld [vmem:[#allocation8 + $0x20] sm:$0xff]   ;;  %v1067_v10 = vld [vmem:[#allocation8 + $0x30] sm:$0xff]  }
  0x78   :  { %966 = vmatprep.mubr.msk.bf16.mxu0 %vm1252_vm0, %v1251_v1  ;;  %943 = vmatpush3.bf16.msra.mxu1 %v1045_v12 }
  0x79   :  { %944 = vmatprep.subr.bf16.mxu1 %v1251_v1  ;;  %951 = vmatpush3.bf16.msra.mxu0 %v1053_v14  ;;  %v1068_v14 = vld [vmem:[#allocation8 + $0x38] sm:$0xff]  }
  0x7a   :  { %952 = vmatprep.subr.bf16.mxu0 %v1251_v1 }
  0x7c   :  { %945 = vmatpush3.bf16.msra.mxu1 %v1046_v13 }
  0x7d   :  { %970 = vmatprep.subr.bf16.mxu1 %v1251_v1  ;;  %953 = vmatpush3.bf16.msra.mxu0 %v1054_v15  ;;  %v1069_v15 = vld [vmem:[#allocation10] sm:$0xff]  }
  0x7e   :  { %954 = vmatprep.subr.bf16.mxu0 %v1251_v1 }
  0x81   :  { %955 = vmatpush3.bf16.msra.mxu0 %v1055_v16  ;;  %v1070_v16 = vld [vmem:[#allocation10 + $0x8] sm:$0xff]  }
  0x82   :  { %956 = vmatprep.subr.bf16.mxu0 %v1251_v1 }
  0x85   :  { %957 = vmatpush3.bf16.msra.mxu0 %v1056_v17  ;;  %v1071_v17 = vld [vmem:[#allocation10 + $0x10] sm:$0xff]  }
  0x86   :  { %958 = vmatprep.subr.bf16.mxu0 %v1251_v1 }
  0x89   :  { %959 = vmatpush3.bf16.msra.mxu0 %v1057_v18  ;;  %v1072_v18 = vld [vmem:[#allocation10 + $0x18] sm:$0xff]  }
  0x8a   :  { %960 = vmatprep.subr.bf16.mxu0 %v1251_v1 }
  0x8d   :  { %961 = vmatpush3.bf16.msra.mxu0 %v1058_v19  ;;  %v1073_v19 = vld [vmem:[#allocation10 + $0x20] sm:$0xff]  }
  0x8e   :  { %962 = vmatprep.subr.bf16.mxu0 %v1251_v1 }
  0x91   :  { %963 = vmatpush3.bf16.msra.mxu0 %v1059_v20  ;;  %v1074_v20 = vld [vmem:[#allocation10 + $0x28] sm:$0xff]  }
  0x92   :  { %964 = vmatprep.subr.bf16.mxu0 %v1251_v1 }
  0x95   :  { %965 = vmatpush3.bf16.msra.mxu0 %v1060_v34 }
  0x96   :  { %990 = vmatprep.subr.bf16.mxu0 %v1251_v1 }
 0x14a   :  { %v191_v21 = vpop.f32.mrb[0].mxu0 }
 0x14b   :  { %v197_v23 = vpack.c.bf16 %v191_v21, %v191_v21  ;;  %v936_v24 = vpop.f32.mrb[1].mxu0  ;;  %v1075_v21 = vld [vmem:[#allocation10 + $0x30] sm:$0xff]  }
 0x14c   :  { %v194_v25 = vpop.f32.mrb[2].mxu0 }
 0x14d   :  { %v937_v26 = vpop.f32.mrb[3].mxu0  ;;  %947 = vmatmul.mubr.msk.bf16.vlgmr.msra.gmra.mrb[0].mxu1 %vm237_vm3, %v197_v23  ;;  %v851_v23 = vld [vmem:[%s1554_s12] ss:$0 sm:$0xff]  ;;  %s1253_s12 = smov [#allocation13]  }
 0x14e   :  { %971 = vmatpush3.bf16.msra.mxu1 %v1047_v22  ;;  %974 = vmatprep.mubr.msk.bf16.mxu1 %vm1252_vm0, %v1251_v1  ;;  %v1076_v22 = vld [vmem:[#allocation10 + $0x38] sm:$0xff]   ;;  %s828_s0 = sshll.u32 %s1253_s12, 4  ;;  %s829_s0 = int_to_ptr.vmem [resolvable:$true] %s828_s0 }
 0x14f   :  { %972 = vmatprep.subr.bf16.mxu1 %v1251_v1  ;;  %s1209_s15 = scalar_lea.vmem %s829_s0, 32  ;;  %p1214_p7 = scmp.lt.s32.totalorder %s829_s0, %s829_s0 }
 0x150   :  { %p1210_p6 = scmp.ne.s32.totalorder %s829_s0, %s1209_s15  ;;  %p1215_p8 = scmp.lt.s32.totalorder %s1209_s15, %s1209_s15 }
 0x152   :  { %973 = vmatpush3.bf16.msra.mxu1 %v1048_v27  ;;  %p1216_p9 = por %p1215_p8, %p1214_p7 }
 0x153   :  { %978 = vmatprep.subr.bf16.mxu1 %v1251_v1 }
 0x154   :  { %p1217_p10 = pnand %p1216_p9, %p1210_p6 }
 0x155   :  { %975 = vmatmul.mubr.msk.bf16.vlgmr.msra.gmra.mrb[4].mxu1 %vm419_vm4, %v395_v29  ;;  %v869_v29 = vld [vmem:[%s1548_s6] ss:$0 sm:$0xff] }
 0x156   :  { %979 = vmatpush3.bf16.msra.mxu1 %v1049_v30  ;;  %986 = vmatprep.mubr.msk.bf16.mxu1 %vm1252_vm0, %v1251_v1 }
 0x157   :  { %980 = vmatprep.subr.bf16.mxu1 %v1251_v1 }
 0x15a   :  { %981 = vmatpush3.bf16.msra.mxu1 %v1050_v31 }
 0x15b   :  { %982 = vmatprep.subr.bf16.mxu1 %v1251_v1 }
 0x15e   :  { %983 = vmatpush3.bf16.msra.mxu1 %v1051_v32 }
 0x15f   :  { %984 = vmatprep.subr.bf16.mxu1 %v1251_v1 }
 0x162   :  { %985 = vmatpush3.bf16.msra.mxu1 %v1052_v33 }
 0x163   :  { %1010 = vmatprep.subr.bf16.mxu1 %v1251_v1 }
 0x165   :  { %987 = vmatmul.mubr.msk.bf16.vlgmr.msra.gmra.mrb[8].mxu1 %vm237_vm3, %v1429_v8 }
 0x166   :  { %1026 = vmatprep.mubr.msk.bf16.mxu1 %vm1252_vm0, %v1251_v1  ;;  %1011 = vmatpush3.bf16.msra.mxu1 %v1069_v15 }
 0x167   :  { %1012 = vmatprep.subr.bf16.mxu1 %v1251_v1 }
 0x16a   :  { %1013 = vmatpush3.bf16.msra.mxu1 %v1070_v16 }
 0x16b   :  { %1014 = vmatprep.subr.bf16.mxu1 %v1251_v1 }
 0x16e   :  { %1015 = vmatpush3.bf16.msra.mxu1 %v1071_v17 }
 0x16f   :  { %1016 = vmatprep.subr.bf16.mxu1 %v1251_v1 }
 0x172   :  { %1017 = vmatpush3.bf16.msra.mxu1 %v1072_v18 }
 0x173   :  { %1018 = vmatprep.subr.bf16.mxu1 %v1251_v1 }
 0x176   :  { %1019 = vmatpush3.bf16.msra.mxu1 %v1073_v19 }
 0x177   :  { %1020 = vmatprep.subr.bf16.mxu1 %v1251_v1 }
 0x17a   :  { %1021 = vmatpush3.bf16.msra.mxu1 %v1074_v20 }
 0x17b   :  { %1022 = vmatprep.subr.bf16.mxu1 %v1251_v1 }
 0x17e   :  { %1023 = vmatpush3.bf16.msra.mxu1 %v1075_v21 }
 0x17f   :  { %1024 = vmatprep.subr.bf16.mxu1 %v1251_v1 }
 0x182   :  { %1025 = vmatpush3.bf16.msra.mxu1 %v1076_v22 }
 0x220   :  { %v275_v36 = vpop.f32.mrb[0].mxu1 }
 0x221   :  { %v276_v37 = vadd.f32 %v845_v35, %v275_v36  ;;  %v948_v38 = vpop.f32.mrb[1].mxu1 }
 0x222   :  { %v278_v39 = vpop.f32.mrb[2].mxu1 }
 0x223   :  { %v281_v40 = vmax.f32 %v276_v37, 0.0  ;;  %v949_v41 = vpop.f32.mrb[3].mxu1 }
 0x225   :  { %v282_v43 = vpack.c.bf16 %v281_v40, %v281_v40 }
 0x227   :  { %967 = vmatmul.mubr.bf16.vlgmr.msra.gmra.mrb[4].mxu0 %v282_v43 }
 0x228   :  { %991 = vmatpush3.bf16.msra.mxu0 %v1061_v42  ;;  %v457_v44 = vpop.f32.mrb[4].mxu1  ;;  %1006 = vmatprep.mubr.msk.bf16.mxu0 %vm1252_vm0, %v1251_v1 }
 0x229   :  { %992 = vmatprep.subr.bf16.mxu0 %v1251_v1  ;;  %v976_v46 = vpop.f32.mrb[5].mxu1  ;;  %v458_v52 = vadd.f32 %v860_v47, %v457_v44 }
 0x22a   :  { %v460_v48 = vpop.f32.mrb[6].mxu1 }
 0x22b   :  { %v977_v49 = vpop.f32.mrb[7].mxu1  ;;  %v493_v58 = vrot.slane %v458_v52, %v492_v53  ;;  %v501_v59 = vrot.slane %v458_v52, %v500_v55 }
 0x22c   :  { %993 = vmatpush3.bf16.msra.mxu0 %v1062_v45 }
 0x22d   :  { %994 = vmatprep.subr.bf16.mxu0 %v1251_v1  ;;  %v494_v61 = vsel %vm488_vm5, %v493_v58, 0.0  ;;  %v495_v62 = vsel %vm489_vm6, %v493_v58, 0.0 }
 0x22e   :  { %v502_v63 = vsel %vm496_vm7, %v501_v59, %v494_v61  ;;  %v503_v6 = vsel %vm497_vm8, %v501_v59, %v495_v62 }
 0x230   :  { %995 = vmatpush3.bf16.msra.mxu0 %v1063_v50 }
 0x231   :  { %996 = vmatprep.subr.bf16.mxu0 %v1251_v1 }
 0x234   :  { %997 = vmatpush3.bf16.msra.mxu0 %v1064_v56 }
 0x235   :  { %998 = vmatprep.subr.bf16.mxu0 %v1251_v1 }
 0x238   :  { %v573_v0 = vpop.f32.mrb[8].mxu1  ;;  %999 = vmatpush3.bf16.msra.mxu0 %v1065_v60 }
 0x239   :  { %v574_v4 = vadd.f32 %v573_v0, %v502_v63  ;;  %v988_v5 = vpop.f32.mrb[9].mxu1  ;;  %1000 = vmatprep.subr.bf16.mxu0 %v1251_v1 }
 0x23a   :  { %v576_v7 = vpop.f32.mrb[10].mxu1 }
 0x23b   :  { %v577_v8 = vadd.f32 %v576_v7, %v503_v6  ;;  %v989_v9 = vpop.f32.mrb[11].mxu1  ;;  %v580_v11 = vmax.f32 %v574_v4, 0.0 }
 0x23c   :  { %1001 = vmatpush3.bf16.msra.mxu0 %v1066_v2 }
 0x23d   :  { %v581_v12 = vmax.f32 %v577_v8, 0.0  ;;  %1002 = vmatprep.subr.bf16.mxu0 %v1251_v1 }
 0x23f   :  { %v582_v13 = vpack.c.bf16 %v581_v12, %v580_v11 }
 0x240   :  { %1003 = vmatpush3.bf16.msra.mxu0 %v1067_v10 }
 0x241   :  { %1004 = vmatprep.subr.bf16.mxu0 %v1251_v1 }
 0x244   :  { %1005 = vmatpush3.bf16.msra.mxu0 %v1068_v14 }
 0x247   :  { %1007 = vmatmul.mubr.bf16.vlgmr.msra.gmra.mrb[8].mxu0 %v582_v13 }
 0x2fa   :  { %v388_v24 = vpop.f32.mrb[4].mxu0 }
 0x2fb   :  { %v389_v25 = vadd.f32 %v851_v23, %v388_v24  ;;  %v968_v26 = vpop.f32.mrb[5].mxu0 }
 0x2fc   :  { %v391_v27 = vpop.f32.mrb[6].mxu0 }
 0x2fd   :  { %394 = vst [vmem:[#allocation13] sm:$0x3] %v389_v25  ;;  %v969_v28 = vpop.f32.mrb[7].mxu0 }
 0x31a   :  { %v688_v30 = vpop.f32.mrb[8].mxu0 }
 0x31b   :  { %v689_v31 = vadd.f32 %v869_v29, %v688_v30  ;;  %v1008_v32 = vpop.f32.mrb[9].mxu0 }
 0x31c   :  { %v691_v1 = vpop.f32.mrb[10].mxu0 }
 0x31d   :  { %v692_v33 = vadd.f32 %v869_v29, %v691_v1  ;;  %v1009_v34 = vpop.f32.mrb[11].mxu0  ;;  %v695_v35 = vmax.f32 %v689_v31, 0.0 }
 0x31f   :  { %v696_v36 = vmax.f32 %v692_v33, 0.0 }
 0x321   :  { %v697_v37 = vpack.c.bf16 %v696_v36, %v695_v35 }
 0x323   :  { %1027 = vmatmul.mubr.bf16.vlgmr.msra.gmra.mrb[12].mxu1 %v697_v37 }
 0x324   :  { %1220 = shalt.err (!%p1217_p10)
}
 0x325   :  { %s1221_s28 = scalar_lea.hbm %s1555_s13, 32 }
 0x326   :  { %p1222_p11 = scmp.ne.s32.totalorder %s1555_s13, %s1221_s28  ;;  %p1225_p12 = scmp.lt.u32.totalorder %s1221_s28, %s1555_s13 }
 0x328   :  { %p1227_p13 = pnand %p1225_p12, %p1222_p11 }
 0x32a   :  { %1230 = shalt.err (!%p1227_p13)
}
 0x32b   :  { %831 = dma.vmem_to_hbm [thread:$0]  %s829_s0, 32, %s1555_s13, [#allocation4]   ;;  %vm815_vm9 = vcmp.lt.s32.totalorder %v1421_v3, 2  ;;  %vm816_vm10 = vcmp.eq.s32.totalorder %v1421_v3, 9  ;;  %v878_v38 = vld [vmem:[%s1550_s8] ss:$0 sm:$0xff] }
 0x32c   :  { %vm817_vm11 = vmor %vm815_vm9, %vm816_vm10  ;;  %vm819_vm12 = vcmp.eq.s32.totalorder %v1421_v3, 10 }
 0x3f6   :  { %v803_v39 = vpop.f32.mrb[12].mxu1 }
 0x3f7   :  { %v804_v40 = vadd.f32 %v878_v38, %v803_v39  ;;  %v1028_v41 = vpop.f32.mrb[13].mxu1 }
 0x3f8   :  { %v806_v42 = vpop.f32.mrb[14].mxu1 }
 0x3f9   :  { %810 = vst [vmem:[%s1556_s14] sm:$0xff] %v804_v40  ;;  %887 = vst [vmem:[%s1556_s14 + $0x10] sm:$0xff] %v804_v40  ;;  %v818_v43 = vsel %vm817_vm11, 0.0, %v804_v40  ;;  %v807_v44 = vadd.f32 %v878_v38, %v806_v42  ;;  %v1029_v45 = vpop.f32.mrb[15].mxu1 }
 0x3fa   :  { %v820_v46 = vsel %vm819_vm12, 1.0, %v818_v43 }
 0x3fb   :  { %889 = vst [vmem:[%s1556_s14 + $0x10] sm:$0x3] %v820_v46  ;;  %811 = vst [vmem:[%s1556_s14 + $0x8] sm:$0xff] %v807_v44 }
 0x3fc   :  { %888 = vst [vmem:[%s1556_s14 + $0x18] sm:$0xff] %v807_v44 }
 0x3fd   :  { %1239 = dma.done.wait [#allocation4], 32  }
 0x3fe   :  { %1240 = vsyncadd [#allocation4], 4294967264 }
 0x3ff   :  { %839 = vsyncpa [#allocation3], 1 }
 0x400   :  { %840 = vsyncpa [#allocation6], 1 }
 0x401   :  { %841 = vsyncpa [#allocation9], 1 }
 0x402   :  { %842 = vsyncpa [#allocation12], 1 }
 0x403   :  { %843 = vsyncpa [#allocation4], 1 }

</bundles_post_ra>
